<compile_context>
chip_gen: v5e
topology: v5e:2x2
jax: 0.10.0
libtpu: 0.0.40
codegen_flags: <defaults>
</compile_context>

<pallas_src>
import functools

import jax
import jax.numpy as jnp
from jax import lax
from jax.experimental import pallas as pl
from jax.experimental.pallas import tpu as pltpu


def dhel_kernel(*refs, include_augs, batch_size, m_pad):
    if include_augs:
        (za_r_ref, za_c_ref, zp_r_ref, zp_c_ref,
         out_ref, acc_a_ref, acc_p_ref) = refs
    else:
        za_r_ref, za_c_ref, zp_r_ref, out_ref, acc_a_ref = refs
        zp_c_ref = acc_p_ref = None

    i = pl.program_id(0)
    j = pl.program_id(1)
    nj = pl.num_programs(1)

    n_pad = jnp.float32(m_pad - batch_size)
    dn = (((1,), (1,)), ((), ()))   # contract last dims: A @ B.T (no XLU transpose)

    @pl.when(j == 0)
    def _():
        acc_a_ref[...] = jnp.zeros_like(acc_a_ref)
        if include_augs:
            acc_p_ref[...] = jnp.zeros_like(acc_p_ref)

    # Inputs are already row-normalized and pre-scaled by 1/sqrt(tau), so the
    # dot product is sim/tau directly.
    za_r = za_r_ref[...]
    e_a = jnp.exp(lax.dot_general(za_r, za_c_ref[...], dn,
                                  preferred_element_type=jnp.float32))
    acc_a_ref[...] += jnp.sum(e_a, axis=-1, keepdims=True)

    if include_augs:
        e_p = jnp.exp(lax.dot_general(zp_r_ref[...], zp_c_ref[...], dn,
                                      preferred_element_type=jnp.float32))
        acc_p_ref[...] += jnp.sum(e_p, axis=-1, keepdims=True)

    # Remove the self-similarity term only on diagonal blocks.
    @pl.when(i == j)
    def _():
        t = e_a.shape[0]
        eye = (lax.broadcasted_iota(jnp.int32, (t, t), 0)
               == lax.broadcasted_iota(jnp.int32, (t, t), 1))
        acc_a_ref[...] -= jnp.sum(jnp.where(eye, e_a, 0.0), axis=-1, keepdims=True)
        if include_augs:
            acc_p_ref[...] -= jnp.sum(jnp.where(eye, e_p, 0.0),
                                      axis=-1, keepdims=True)

    # Finalize the per-row loss once the column sweep is done.
    @pl.when(j == nj - 1)
    def _():
        # (za/sqrt(tau)) . (zp/sqrt(tau)) == sim/tau
        pos = jnp.sum(za_r * zp_r_ref[...], axis=-1, keepdims=True)
        # each padded (exact-zero) column contributed exactly exp(0) = 1.
        denom_log = jnp.log(acc_a_ref[...] - n_pad)
        if include_augs:
            denom_log = denom_log + jnp.log(acc_p_ref[...] - n_pad)
        # -log(exp(pos)/denom) = log(denom) - pos
        out_ref[...] = denom_log - pos


def dhel_loss(z, tau=0.3, include_augs=True, block=128):
    """Pallas DHEL loss. z: (2M, d) array (anchors then positives). Scalar f32."""
    n, d = z.shape
    assert n % 2 == 0, "z must have an even number of rows (anchors + positives)"
    batch_size = n // 2
    t = int(block)
    assert t % 8 == 0
    m_pad = pl.cdiv(batch_size, t) * t
    d_pad = pl.cdiv(d, 128) * 128
    nblk = m_pad // t

    z = z.astype(jnp.float32)
    # Row-normalize once (hoisted out of the kernel) and fold 1/sqrt(tau) into
    # the same scale.  rsqrt(max(||x||^2,1e-24)) == 1/max(||x||,1e-12), which
    # matches F.normalize's eps behaviour; rsqrt runs on the EUP.
    ss = jnp.sum(z * z, axis=-1, keepdims=True)
    scale = lax.rsqrt(jnp.maximum(ss, jnp.float32(1e-24))) * jnp.float32(float(tau) ** -0.5)
    z = z * scale

    za = jnp.pad(z[:batch_size], ((0, m_pad - batch_size), (0, d_pad - d)))
    zp = jnp.pad(z[batch_size:], ((0, m_pad - batch_size), (0, d_pad - d)))

    kernel = functools.partial(dhel_kernel, include_augs=include_augs,
                               batch_size=batch_size, m_pad=m_pad)

    row_spec = pl.BlockSpec((t, d_pad), lambda i, j: (i, 0))
    col_spec = pl.BlockSpec((t, d_pad), lambda i, j: (j, 0))

    if include_augs:
        in_specs = [row_spec, col_spec, row_spec, col_spec]
        inputs = (za, za, zp, zp)
        scratch = [pltpu.VMEM((t, 1), jnp.float32),
                   pltpu.VMEM((t, 1), jnp.float32)]
    else:
        in_specs = [row_spec, col_spec, row_spec]
        inputs = (za, za, zp)
        scratch = [pltpu.VMEM((t, 1), jnp.float32)]

    n_mm = 2 if include_augs else 1
    cost = pl.CostEstimate(
        flops=int(2 * n_mm * m_pad * m_pad * d_pad + 2 * m_pad * d_pad),
        transcendentals=int(n_mm * m_pad * m_pad + (n_mm + 1) * m_pad),
        bytes_accessed=int(n_mm * (nblk + 1) * m_pad * d_pad * 4 + m_pad * 4),
    )

    per_row = pl.pallas_call(
        kernel,
        out_shape=jax.ShapeDtypeStruct((m_pad, 1), jnp.float32),
        grid_spec=pltpu.PrefetchScalarGridSpec(
            num_scalar_prefetch=0,
            grid=(nblk, nblk),
            in_specs=in_specs,
            out_specs=pl.BlockSpec((t, 1), lambda i, j: (i, 0)),
            scratch_shapes=scratch,
        ),
        compiler_params=pltpu.CompilerParams(
            dimension_semantics=("parallel", "arbitrary"),
            vmem_limit_bytes=32 * 1024 * 1024,
        ),
        cost_estimate=cost,
    )(*inputs)

    return jnp.mean(per_row[:batch_size, 0])


def _dhel_ref(z, tau=0.3, include_augs=True):
    """Pure-JAX reference matching the PyTorch forward exactly."""
    batch_size = z.shape[0] // 2
    z = z / jnp.maximum(jnp.linalg.norm(z, axis=1, keepdims=True), 1e-12)
    za, zp = z[:batch_size], z[batch_size:]
    sim_a = jnp.exp(za @ za.T / tau)
    eye = jnp.eye(batch_size, dtype=bool)
    sim_a = jnp.where(eye, 0.0, sim_a)
    pos_sim = jnp.exp(jnp.sum(za * zp, axis=-1) / tau)
    if include_augs:
        sim_p = jnp.exp(zp @ zp.T / tau)
        sim_p = jnp.where(eye, 0.0, sim_p)
        denom = sim_a.sum(-1) * sim_p.sum(-1)
    else:
        denom = sim_a.sum(-1)
    return -jnp.mean(jnp.log(pos_sim / denom))


if __name__ == "__main__":
    key = jax.random.PRNGKey(0)
    M, d = 100, 48                      # M anchors + M positives, dim d
    z = jax.random.normal(key, (2 * M, d), dtype=jnp.float32)

    # block=64 -> m_pad=128, grid=(2,2): exercises multi-block accumulation,
    # diagonal-only masking and the padded-row/column correction paths.
    loss = dhel_loss(z, tau=0.3, include_augs=True, block=64)
    jax.block_until_ready(loss)
    ref = _dhel_ref(z, tau=0.3, include_augs=True)
    assert jnp.allclose(loss, ref, rtol=1e-4, atol=1e-5), (loss, ref)

    loss2 = dhel_loss(z, tau=0.3, include_augs=False, block=64)
    jax.block_until_ready(loss2)
    ref2 = _dhel_ref(z, tau=0.3, include_augs=False)
    assert jnp.allclose(loss2, ref2, rtol=1e-4, atol=1e-5), (loss2, ref2)

    print("KERNEL_OK")
</pallas_src>

<mosaic_0001>
module attributes {stable_mosaic.version = 11 : i64} {
  func.func @dhel_kernel(%arg0: i32, %arg1: i32, %arg2: memref<64x128xf32, #tpu.memory_space<vmem>>, %arg3: memref<64x128xf32, #tpu.memory_space<vmem>>, %arg4: memref<64x128xf32, #tpu.memory_space<vmem>>, %arg5: memref<64x128xf32, #tpu.memory_space<vmem>>, %arg6: memref<64x1xf32, #tpu.memory_space<vmem>>, %arg7: memref<64x1xf32, #tpu.memory_space<vmem>>, %arg8: memref<64x1xf32, #tpu.memory_space<vmem>>) attributes {dimension_semantics = [#tpu.dimension_semantics<parallel>, #tpu.dimension_semantics<arbitrary>], iteration_bounds = array<i64: 2, 2>, scalar_prefetch = 0 : i64, scratch_operands = 2 : i64, tpu.core_type = #tpu.core_type<tc>, window_params = [{transform_indices = @transform_0, window_bounds = array<i64: 64, 128>}, {transform_indices = @transform_1, window_bounds = array<i64: 64, 128>}, {transform_indices = @transform_2, window_bounds = array<i64: 64, 128>}, {transform_indices = @transform_3, window_bounds = array<i64: 64, 128>}, {transform_indices = @transform_4, window_bounds = array<i64: 64, 1>}]} {
    %c0_i32 = arith.constant 0 : i32
    %0 = arith.cmpi eq, %arg1, %c0_i32 : i32
    %1 = arith.extui %0 : i1 to i32
    %c0_i32_0 = arith.constant 0 : i32
    %2 = arith.cmpi ne, %1, %c0_i32_0 : i32
    scf.if %2 {
      %cst_22 = arith.constant 0.000000e+00 : f32
      %27 = vector.broadcast %cst_22 : f32 to vector<64x1xf32>
      %c0_23 = arith.constant 0 : index
      %c0_24 = arith.constant 0 : index
      %28 = vector.load %arg7[%c0_23, %c0_24] : memref<64x1xf32, #tpu.memory_space<vmem>>, vector<64x1xf32>
      tpu.vector_store %arg7[%c0_23, %c0_24], %27 {strides = array<i32>} : memref<64x1xf32, #tpu.memory_space<vmem>>, vector<64x1xf32>,
      %cst_25 = arith.constant 0.000000e+00 : f32
      %29 = vector.broadcast %cst_25 : f32 to vector<64x1xf32>
      %c0_26 = arith.constant 0 : index
      %c0_27 = arith.constant 0 : index
      %30 = vector.load %arg8[%c0_26, %c0_27] : memref<64x1xf32, #tpu.memory_space<vmem>>, vector<64x1xf32>
      tpu.vector_store %arg8[%c0_26, %c0_27], %29 {strides = array<i32>} : memref<64x1xf32, #tpu.memory_space<vmem>>, vector<64x1xf32>,
    } else {
    }
    %c0 = arith.constant 0 : index
    %c0_1 = arith.constant 0 : index
    %3 = vector.load %arg2[%c0, %c0_1] : memref<64x128xf32, #tpu.memory_space<vmem>>, vector<64x128xf32>
    %c0_2 = arith.constant 0 : index
    %c0_3 = arith.constant 0 : index
    %4 = vector.load %arg3[%c0_2, %c0_3] : memref<64x128xf32, #tpu.memory_space<vmem>>, vector<64x128xf32>
    %cst = arith.constant dense<0.000000e+00> : vector<64x64xf32>
    %5 = tpu.matmul %3, %4, %cst {dimension_numbers = #tpu.dot_dimension_numbers<[1], [1], [0], [0], [0, 0, 1, 0], [], []>} : vector<64x128xf32>, vector<64x128xf32>, vector<64x64xf32> -> vector<64x64xf32>
    %6 = math.exp %5 : vector<64x64xf32>
    %c0_4 = arith.constant 0 : index
    %c0_5 = arith.constant 0 : index
    %7 = vector.load %arg7[%c0_4, %c0_5] : memref<64x1xf32, #tpu.memory_space<vmem>>, vector<64x1xf32>
    %cst_6 = arith.constant dense<0.000000e+00> : vector<64xf32>
    %8 = vector.multi_reduction <add>, %6, %cst_6 [1] : vector<64x64xf32> to vector<64xf32>
    %9 = vector.shape_cast %8 : vector<64xf32> to vector<64x1xf32>
    %10 = arith.addf %7, %9 : vector<64x1xf32>
    %c0_7 = arith.constant 0 : index
    %c0_8 = arith.constant 0 : index
    %11 = vector.load %arg7[%c0_7, %c0_8] : memref<64x1xf32, #tpu.memory_space<vmem>>, vector<64x1xf32>
    tpu.vector_store %arg7[%c0_7, %c0_8], %10 {strides = array<i32>} : memref<64x1xf32, #tpu.memory_space<vmem>>, vector<64x1xf32>,
    %c0_9 = arith.constant 0 : index
    %c0_10 = arith.constant 0 : index
    %12 = vector.load %arg4[%c0_9, %c0_10] : memref<64x128xf32, #tpu.memory_space<vmem>>, vector<64x128xf32>
    %c0_11 = arith.constant 0 : index
    %c0_12 = arith.constant 0 : index
    %13 = vector.load %arg5[%c0_11, %c0_12] : memref<64x128xf32, #tpu.memory_space<vmem>>, vector<64x128xf32>
    %cst_13 = arith.constant dense<0.000000e+00> : vector<64x64xf32>
    %14 = tpu.matmul %12, %13, %cst_13 {dimension_numbers = #tpu.dot_dimension_numbers<[1], [1], [0], [0], [0, 0, 1, 0], [], []>} : vector<64x128xf32>, vector<64x128xf32>, vector<64x64xf32> -> vector<64x64xf32>
    %15 = math.exp %14 : vector<64x64xf32>
    %c0_14 = arith.constant 0 : index
    %c0_15 = arith.constant 0 : index
    %16 = vector.load %arg8[%c0_14, %c0_15] : memref<64x1xf32, #tpu.memory_space<vmem>>, vector<64x1xf32>
    %cst_16 = arith.constant dense<0.000000e+00> : vector<64xf32>
    %17 = vector.multi_reduction <add>, %15, %cst_16 [1] : vector<64x64xf32> to vector<64xf32>
    %18 = vector.shape_cast %17 : vector<64xf32> to vector<64x1xf32>
    %19 = arith.addf %16, %18 : vector<64x1xf32>
    %c0_17 = arith.constant 0 : index
    %c0_18 = arith.constant 0 : index
    %20 = vector.load %arg8[%c0_17, %c0_18] : memref<64x1xf32, #tpu.memory_space<vmem>>, vector<64x1xf32>
    tpu.vector_store %arg8[%c0_17, %c0_18], %19 {strides = array<i32>} : memref<64x1xf32, #tpu.memory_space<vmem>>, vector<64x1xf32>,
    %21 = arith.cmpi eq, %arg0, %arg1 : i32
    %22 = arith.extui %21 : i1 to i32
    %c0_i32_19 = arith.constant 0 : i32
    %23 = arith.cmpi ne, %22, %c0_i32_19 : i32
    scf.if %23 {
      %27 = tpu.iota {dimensions = array<i32: 0>} : vector<64x64xi32>
      %28 = tpu.iota {dimensions = array<i32: 1>} : vector<64x64xi32>
      %29 = arith.cmpi eq, %27, %28 : vector<64x64xi32>
      %c0_22 = arith.constant 0 : index
      %c0_23 = arith.constant 0 : index
      %30 = vector.load %arg7[%c0_22, %c0_23] : memref<64x1xf32, #tpu.memory_space<vmem>>, vector<64x1xf32>
      %cst_24 = arith.constant 0.000000e+00 : f32
      %31 = vector.broadcast %cst_24 : f32 to vector<64x64xf32>
      %32 = arith.select %29, %6, %31 : vector<64x64xi1>, vector<64x64xf32>
      %cst_25 = arith.constant dense<0.000000e+00> : vector<64xf32>
      %33 = vector.multi_reduction <add>, %32, %cst_25 [1] : vector<64x64xf32> to vector<64xf32>
      %34 = vector.shape_cast %33 : vector<64xf32> to vector<64x1xf32>
      %35 = arith.subf %30, %34 : vector<64x1xf32>
      %c0_26 = arith.constant 0 : index
      %c0_27 = arith.constant 0 : index
      %36 = vector.load %arg7[%c0_26, %c0_27] : memref<64x1xf32, #tpu.memory_space<vmem>>, vector<64x1xf32>
      tpu.vector_store %arg7[%c0_26, %c0_27], %35 {strides = array<i32>} : memref<64x1xf32, #tpu.memory_space<vmem>>, vector<64x1xf32>,
      %c0_28 = arith.constant 0 : index
      %c0_29 = arith.constant 0 : index
      %37 = vector.load %arg8[%c0_28, %c0_29] : memref<64x1xf32, #tpu.memory_space<vmem>>, vector<64x1xf32>
      %cst_30 = arith.constant 0.000000e+00 : f32
      %38 = vector.broadcast %cst_30 : f32 to vector<64x64xf32>
      %39 = arith.select %29, %15, %38 : vector<64x64xi1>, vector<64x64xf32>
      %cst_31 = arith.constant dense<0.000000e+00> : vector<64xf32>
      %40 = vector.multi_reduction <add>, %39, %cst_31 [1] : vector<64x64xf32> to vector<64xf32>
      %41 = vector.shape_cast %40 : vector<64xf32> to vector<64x1xf32>
      %42 = arith.subf %37, %41 : vector<64x1xf32>
      %c0_32 = arith.constant 0 : index
      %c0_33 = arith.constant 0 : index
      %43 = vector.load %arg8[%c0_32, %c0_33] : memref<64x1xf32, #tpu.memory_space<vmem>>, vector<64x1xf32>
      tpu.vector_store %arg8[%c0_32, %c0_33], %42 {strides = array<i32>} : memref<64x1xf32, #tpu.memory_space<vmem>>, vector<64x1xf32>,
    } else {
    }
    %c1_i32 = arith.constant 1 : i32
    %24 = arith.cmpi eq, %arg1, %c1_i32 : i32
    %25 = arith.extui %24 : i1 to i32
    %cst_20 = arith.constant 2.800000e+01 : f32
    %c0_i32_21 = arith.constant 0 : i32
    %26 = arith.cmpi ne, %25, %c0_i32_21 : i32
    scf.if %26 {
      %c0_22 = arith.constant 0 : index
      %c0_23 = arith.constant 0 : index
      %27 = vector.load %arg4[%c0_22, %c0_23] : memref<64x128xf32, #tpu.memory_space<vmem>>, vector<64x128xf32>
      %28 = arith.mulf %3, %27 : vector<64x128xf32>
      %cst_24 = arith.constant dense<0.000000e+00> : vector<64xf32>
      %29 = vector.multi_reduction <add>, %28, %cst_24 [1] : vector<64x128xf32> to vector<64xf32>
      %30 = vector.shape_cast %29 : vector<64xf32> to vector<64x1xf32>
      %c0_25 = arith.constant 0 : index
      %c0_26 = arith.constant 0 : index
      %31 = vector.load %arg7[%c0_25, %c0_26] : memref<64x1xf32, #tpu.memory_space<vmem>>, vector<64x1xf32>
      %32 = vector.broadcast %cst_20 : f32 to vector<64x1xf32>
      %33 = arith.subf %31, %32 : vector<64x1xf32>
      %34 = math.log %33 : vector<64x1xf32>
      %c0_27 = arith.constant 0 : index
      %c0_28 = arith.constant 0 : index
      %35 = vector.load %arg8[%c0_27, %c0_28] : memref<64x1xf32, #tpu.memory_space<vmem>>, vector<64x1xf32>
      %36 = vector.broadcast %cst_20 : f32 to vector<64x1xf32>
      %37 = arith.subf %35, %36 : vector<64x1xf32>
      %38 = math.log %37 : vector<64x1xf32>
      %39 = arith.addf %34, %38 : vector<64x1xf32>
      %40 = arith.subf %39, %30 : vector<64x1xf32>
      %c0_29 = arith.constant 0 : index
      %c0_30 = arith.constant 0 : index
      %41 = vector.load %arg6[%c0_29, %c0_30] : memref<64x1xf32, #tpu.memory_space<vmem>>, vector<64x1xf32>
      tpu.vector_store %arg6[%c0_29, %c0_30], %40 {strides = array<i32>} : memref<64x1xf32, #tpu.memory_space<vmem>>, vector<64x1xf32>,
    } else {
    }
    return
  }
  func.func @transform_0(%arg0: i32, %arg1: i32) -> (i32, i32) {
    %c0_i32 = arith.constant 0 : i32
    %c0_i32_0 = arith.constant 0 : i32
    return %arg0, %c0_i32 : i32, i32
  }
  func.func @transform_1(%arg0: i32, %arg1: i32) -> (i32, i32) {
    %c0_i32 = arith.constant 0 : i32
    %c0_i32_0 = arith.constant 0 : i32
    return %arg1, %c0_i32 : i32, i32
  }
  func.func @transform_2(%arg0: i32, %arg1: i32) -> (i32, i32) {
    %c0_i32 = arith.constant 0 : i32
    %c0_i32_0 = arith.constant 0 : i32
    return %arg0, %c0_i32 : i32, i32
  }
  func.func @transform_3(%arg0: i32, %arg1: i32) -> (i32, i32) {
    %c0_i32 = arith.constant 0 : i32
    %c0_i32_0 = arith.constant 0 : i32
    return %arg1, %c0_i32 : i32, i32
  }
  func.func @transform_4(%arg0: i32, %arg1: i32) -> (i32, i32) {
    %c0_i32 = arith.constant 0 : i32
    %c0_i32_0 = arith.constant 0 : i32
    return %arg0, %c0_i32 : i32, i32
  }
}

</mosaic_0001>

<bundles_post_ra>
// kernel: tpu_custom_call.1
= control target key start
LH: loop header
LB: loop body
LE: loop exit
PB: predicated region body
PF: predicated region fallthrough
CT: control target
= control target key end

     0   :  { %s2033_s0 = inlined_call_operand.hbm [shape: f32[128,128], index: 0, kind: input, shape index: {}]   ;;  %s2034_s1 = inlined_call_operand.hbm [shape: f32[128,128], index: 1, kind: input, shape index: {}]   ;;  %s2035_s2 = inlined_call_operand.hbm [shape: f32[128,128], index: 2, kind: input, shape index: {}]   ;;  %s2036_s3 = inlined_call_operand.hbm [shape: f32[128,128], index: 3, kind: input, shape index: {}]   ;;  %s2037_s4 = inlined_call_operand.vmem [shape: f32[128,1], index: 4, kind: output, shape index: {}]  }
   0x1   :  { %2048 = sst [smem:[#allocation21_spill]] %s2033_s0 }
   0x2   :  { %2049 = sst [smem:[#allocation22_spill]] %s2034_s1 }
   0x3   :  { %2050 = sst [smem:[#allocation23_spill]] %s2035_s2 }
   0x4   :  { %2051 = sst [smem:[#allocation24_spill]] %s2037_s4 }
   0x5   :  { %9 = vsyncpa [#allocation5], 0 }
   0x6   :  { %11 = vsyncpa [#allocation5 + $0x1], 0 }
   0x7   :  { %12 = vsyncpa [#allocation7], 0 }
   0x8   :  { %14 = vsyncpa [#allocation7 + $0x1], 0 }
   0x9   :  { %15 = vsyncpa [#allocation10], 0 }
   0xa   :  { %17 = vsyncpa [#allocation10 + $0x1], 0  ;;  %s1522_s15 = smov 0   ;;  %s1524_s16 = smov 0  }
   0xb   :  { %s1526_s17 = smov 0   ;;  %s1528_s18 = smov 0  }
   0xc   :  { %s1530_s19 = smov 0   ;;  %s1532_s20 = smov 0  }
   0xd   :  { %s1534_s21 = smov 0   ;;  %s1536_s22 = smov 0  }
   0xe   :  { %s1538_s23 = smov 0   ;;  %s1540_s24 = smov 0  }
   0xf   :  { %s1542_s25 = smov 0  }
  0x10 LB: > { %2052 = sst [smem:[#allocation15_spill]] %s1476_s21  ;;  %s2038_s26 = sadd.s32 4294967295, %s1492_s25   ;;  %s1492_s25 = sphi %s1542_s25, %s23_s25   ;;  %s1488_s24 = sphi %s1540_s24, %s2083_s24   ;;  %s1484_s23 = sphi %s1538_s23, %s2091_s23   ;;  %s1480_s22 = sphi %s1536_s22, %s2081_s22   ;;  %s1476_s21 = sphi %s1534_s21, %s2090_s21   ;;  %s1472_s20 = sphi %s1532_s20, %s2089_s20   ;;  %s1468_s19 = sphi %s1530_s19, %s2088_s19   ;;  %s1464_s18 = sphi %s1528_s18, %s2087_s18   ;;  %s1460_s17 = sphi %s1526_s17, %s2086_s17   ;;  %s1456_s16 = sphi %s1524_s16, %s2085_s16   ;;  %s1452_s15 = sphi %s1522_s15, %s2084_s15  }
  0x11   : > { %2053 = sst [smem:[#allocation16_spill]] %s1480_s22  ;;  %s32_s27 = sadd.s32 1, %s1484_s23 }
  0x12   : > { %2054 = sst [smem:[#allocation17_spill]] %s1488_s24  ;;  %p1577_p0 = scmp.ge.s32.totalorder %s32_s27, 2 }
  0x13   : > { %p50_p1 = scmp.eq.s32.totalorder %s1492_s25, 0  ;;  %p1584_p2 = scmp.eq.s32.totalorder %s2038_s26, 0 }
  0x14   : > { %s68_s30 = sadd.s32 1, %s1460_s17  ;;  %s2093_s27 = smov (%p1577_p0, %s32_s27), 0 }
  0x15   : > { %2057 = sst [smem:[#allocation18_spill]] %s2093_s27  ;;  %p75_p3 = scmp.ne.s32.totalorder %s1460_s17, %s1456_s16 }
  0x16   : > { %p81_p4 = scmp.ne.s32.totalorder %s1456_s16, %s1452_s15  ;;  %s65_s5 = ssub.s32 %s1484_s23, %s2093_s27 }
  0x17   : > { %p66_p5 = scmp.eq.s32.totalorder %s65_s5, 0  ;;  %p1600_p6 = por %p75_p3, %p50_p1 }
  0x18   : > { %p1606_p7 = por %p81_p4, %p1584_p2  ;;  %p1114_p8 = scmp.lt.s32.totalorder %s1492_s25, 4 }
  0x19   : > { %s1612_s8 = scalar_select %p66_p5, %s1460_s17, %s68_s30  }
  0x1a   : > { %s205_s9 = sand.u32 1, %s1492_s25   ;;  %s2039_s10 = sand.u32 1, %s1460_s17  }
  0x1b   : > { %2060 = sst [smem:[#allocation19_spill]] %s1612_s8  ;;  %s1618_s11 = sshll.u32 %s2039_s10, 6 }
  0x1c   : > { %s2040_s12 = sshll.u32 %s1484_s23, 6  ;;  %s2061_s1 = sld [smem:[#allocation22_spill]] }
  0x1d   : > { %s209_s5 = scalar_lea.vmem [#allocation6], %s1618_s11  ;;  %p1631_p9 = pnand %p1114_p8, %p1600_p6 }
  0x1e   : > { %s217_s30 = sshll.u32 %s209_s5, 4  ;;  %p1045_p10 = scmp.ge.s32.totalorder %s1492_s25, 1  ;;  %s218_s30 = int_to_ptr.vmem [resolvable:$true] %s217_s30 }
  0x1f   : > { %p269_p11 = scmp.lt.s32.totalorder %s1492_s25, 5  ;;  %s1637_s13 = scalar_lea.sflag [#allocation7], %s205_s9 }
  0x20   : > { %s2041_s14 = smov 128   ;;  %s35_s5 = sadd.s32 1, %s1488_s24 }
  0x21   : > { %p1645_p12 = pnand %p1045_p10, %p269_p11  ;;  %s2095_s5 = smov (!%p1577_p0, %s35_s5), %s1488_s24 }
  0x22   : > { %s214_s15 = scalar_lea.hbm %s2061_s1, %s2040_s12  ;;  %s42_s12 = sadd.s32 1, %s1472_s20 }
  0x23   : > { %s215_s26 = sshll.u32 %s214_s15, 4  ;;  %s2043_s15 = smov 8   ;;  %s216_s26 = int_to_ptr.hbm [resolvable:$true] %s215_s26 }
  0x24   : > { %1107 = dma.hbm_to_vmem [thread:$0]  (!%p1631_p9), %s216_s26, 1024, %s218_s30, %s1637_s13, %s2041_s14, %s2041_s14, %s2043_s15  }
  0x25   : > { %p49_p13 = scmp.ne.s32.totalorder %s1472_s20, %s1468_s19  ;;  %p55_p3 = scmp.ne.s32.totalorder %s1468_s19, %s1464_s18 }
  0x26   : > { %p37_p4 = scmp.ge.s32.totalorder %s2095_s5, 2  ;;  %s183_s9 = sand.u32 1, %s1472_s20  }
  0x27   : > { %p1661_p5 = por %p50_p1, %p49_p13  ;;  %p1667_p6 = por %p1584_p2, %p55_p3 }
  0x28   : > { %s2097_s5 = smov (%p37_p4, %s2095_s5), 0  ;;  %s1033_s28 = sshll.u32 %s183_s9, 6 }
  0x29   : > { %2066 = sst [smem:[#allocation20_spill]] %s2097_s5  ;;  %s39_s30 = ssub.s32 %s1488_s24, %s2097_s5 }
  0x2a   : > { %p40_p0 = scmp.eq.s32.totalorder %s39_s30, 0  ;;  %s1073_s18 = sshll.u32 %s1488_s24, 6 }
  0x2b   : > { %s2067_s0 = sld [smem:[#allocation21_spill]]  ;;  %s187_s8 = scalar_lea.vmem [#allocation4], %s1033_s28 }
  0x2c   : > { %s195_s29 = sshll.u32 %s187_s8, 4  ;;  %p1102_p1 = pnand %p1114_p8, %p1661_p5  ;;  %s196_s29 = int_to_ptr.vmem [resolvable:$true] %s195_s29 }
  0x2d   : > { %s1680_s21 = scalar_select %p40_p0, %s1472_s20, %s42_s12  }
  0x2e   : > { %s2068_s2 = sld [smem:[#allocation23_spill]]  ;;  %s184_s15 = scalar_lea.sflag [#allocation5], %s183_s9 }
  0x2f   : > { %s2070_s22 = smov 128   ;;  %s231_s8 = scalar_lea.vmem [#allocation8], %s1033_s28 }
  0x30   : > { %s2071_s1 = sshll.u32 %s1484_s23, 6 }
  0x31   : > { %s192_s27 = scalar_lea.hbm %s2067_s0, %s1073_s18  ;;  %s2069_s0 = smov 8  }
  0x32   : > { %s193_s4 = sshll.u32 %s192_s27, 4  ;;  %s239_s27 = sshll.u32 %s231_s8, 4  ;;  %s194_s4 = int_to_ptr.hbm [resolvable:$true] %s193_s4  ;;  %s240_s27 = int_to_ptr.vmem [resolvable:$true] %s239_s27 }
  0x33   : > { %1104 = dma.hbm_to_vmem [thread:$0]  (!%p1102_p1), %s194_s4, 1024, %s196_s29, %s184_s15, %s2070_s22, %s2070_s22, %s2069_s0  }
  0x34   : > { %s236_s24 = scalar_lea.hbm %s2068_s2, %s1073_s18  ;;  %s258_s18 = scalar_lea.hbm %s2036_s3, %s2071_s1 }
  0x35   : > { %s237_s14 = sshll.u32 %s236_s24, 4  ;;  %s259_s30 = sshll.u32 %s258_s18, 4  ;;  %s238_s14 = int_to_ptr.hbm [resolvable:$true] %s237_s14  ;;  %s260_s30 = int_to_ptr.hbm [resolvable:$true] %s259_s30 }
  0x36   : > { %1110 = dma.hbm_to_vmem [thread:$0]  (!%p1102_p1), %s238_s14, 1024, %s240_s27, %s1637_s13, %s2070_s22, %s2070_s22, %s2069_s0  }
  0x37   : > { %s253_s24 = scalar_lea.vmem [#allocation9], %s1618_s11  ;;  %s2072_s2 = sand.u32 1, %s1460_s17  }
  0x38   : > { %s261_s9 = sshll.u32 %s253_s24, 4  ;;  %s250_s4 = scalar_lea.sflag [#allocation10], %s2072_s2  ;;  %s262_s9 = int_to_ptr.vmem [resolvable:$true] %s261_s9 }
  0x39   : > { %1113 = dma.hbm_to_vmem [thread:$0]  (!%p1631_p9), %s260_s30, 1024, %s262_s9, %s250_s4, %s2070_s22, %s2070_s22, %s2069_s0  }
  0x3a   : > { %273 = sbr.rel (%p1645_p12) target bundleno = 757 (0x2f5), region = 36  ;;  %s275_s13 = sand.u32 (!%p1645_p12), 1, %s1468_s19  }
  0x3b   : > { %s1046_s28 = sshll.u32 (!%p1645_p12), %s275_s13, 6  ;;  %s276_s29 = scalar_lea.sflag (!%p1645_p12), [#allocation5], %s275_s13 }
  0x3c   : > { %s1712_s14 = scalar_lea.vmem (!%p1645_p12), [#allocation4], %s1046_s28 }
  0x3f   : > { %1435 = dma.done.wait (%p1667_p6), %s276_s29, 1024  }
  0x40   : > { %1437 = vsyncadd (%p1667_p6), %s276_s29, 4294966272  ;;  %s2073_s2 = sadd.s32 4294967295, %s1492_s25   ;;  %s287_s22 = sand.u32 1, %s1456_s16  }
  0x41   : > { %s285_s0 = sand.u32 1, %s2073_s2   ;;  %s1047_s10 = sshll.u32 %s287_s22, 6 }
  0x42   : > { %s286_s11 = scalar_lea.sflag [#allocation7], %s285_s0  ;;  %s1721_s6 = scalar_lea.vmem [#allocation6], %s1047_s10 }
  0x43   : > { %1439 = dma.done.wait (%p1606_p7), %s286_s11, 1024  }
  0x44   : > { %1441 = vsyncadd (%p1606_p7), %s286_s11, 4294966272  ;;  %s1727_s15 = scalar_lea.vmem [#allocation8], %s1046_s28 }
  0x45   : > { %1443 = dma.done.wait (%p1667_p6), %s286_s11, 1024  }
  0x46   : > { %1445 = vsyncadd (%p1667_p6), %s286_s11, 4294966272  ;;  %s306_s8 = scalar_lea.sflag [#allocation10], %s287_s22  ;;  %s1733_s27 = scalar_lea.vmem [#allocation9], %s1047_s10 }
  0x47   : > { %1447 = dma.done.wait (%p1606_p7), %s306_s8, 1024  }
  0x48   : > { %1449 = vsyncadd (%p1606_p7), %s306_s8, 4294966272  ;;  %s2074_s1 = sld [smem:[#allocation16_spill]] }
  0x49   : > { %s2075_s24 = sld [smem:[#allocation24_spill]] }
  0x4a   : > { %s2076_s26 = sld [smem:[#allocation15_spill]] }
  0x4e   : > { %s1050_s12 = sshll.u32 %s2074_s1, 3 }
  0x4f   : > { %p355_p2 = scmp.lt.s32.totalorder %s1050_s12, 15 }
  0x50   : > { %p1052_p8 = scmp.ne.s32.totalorder %s2076_s26, 0 }
  0x51   : > { %s2099_s12 = smov (!%p355_p2, %s1050_s12), 15 }
  0x52   : > { %s1051_s5 = sshll.u32 %s2099_s12, 3  ;;  %363 = sbr.rel (%p1052_p8) target bundleno = 104 (0x68), region = 56 }
  0x53   : > { %s1743_s9 = scalar_lea.vmem %s2075_s24, %s1051_s5 }
  0x57   : > { %vm364_vm0 = vcmask 7168   ;;  %v1496_v0 = vmov 0.0  }
  0x58   : > { %365 = vst.msk [vmem:[#allocation2] sm:$0xff] %vm364_vm0, %v1496_v0 }
  0x59   : > { %366 = vst.msk [vmem:[#allocation2 + $0x8] sm:$0xff] %vm364_vm0, %v1496_v0 }
  0x5a   : > { %367 = vst.msk [vmem:[#allocation2 + $0x10] sm:$0xff] %vm364_vm0, %v1496_v0 }
  0x5b   : > { %368 = vst.msk [vmem:[#allocation2 + $0x18] sm:$0xff] %vm364_vm0, %v1496_v0 }
  0x5c   : > { %369 = vst.msk [vmem:[#allocation2 + $0x20] sm:$0xff] %vm364_vm0, %v1496_v0 }
  0x5d   : > { %370 = vst.msk [vmem:[#allocation2 + $0x28] sm:$0xff] %vm364_vm0, %v1496_v0 }
  0x5e   : > { %371 = vst.msk [vmem:[#allocation2 + $0x30] sm:$0xff] %vm364_vm0, %v1496_v0 }
  0x5f   : > { %372 = vst.msk [vmem:[#allocation2 + $0x38] sm:$0xff] %vm364_vm0, %v1496_v0 }
  0x60   : > { %373 = vst.msk [vmem:[#allocation3] sm:$0xff] %vm364_vm0, %v1496_v0 }
  0x61   : > { %374 = vst.msk [vmem:[#allocation3 + $0x8] sm:$0xff] %vm364_vm0, %v1496_v0 }
  0x62   : > { %375 = vst.msk [vmem:[#allocation3 + $0x10] sm:$0xff] %vm364_vm0, %v1496_v0 }
  0x63   : > { %376 = vst.msk [vmem:[#allocation3 + $0x18] sm:$0xff] %vm364_vm0, %v1496_v0 }
  0x64   : > { %377 = vst.msk [vmem:[#allocation3 + $0x20] sm:$0xff] %vm364_vm0, %v1496_v0 }
  0x65   : > { %378 = vst.msk [vmem:[#allocation3 + $0x28] sm:$0xff] %vm364_vm0, %v1496_v0 }
  0x66   : > { %379 = vst.msk [vmem:[#allocation3 + $0x30] sm:$0xff] %vm364_vm0, %v1496_v0 }
  0x67   : > { %380 = vst.msk [vmem:[#allocation3 + $0x38] sm:$0xff] %vm364_vm0, %v1496_v0 }
  0x68 PF: > { %v396_v1 = vld [vmem:[%s1721_s6 + $0x38] sm:$0xff]  ;;  %v395_v3 = vld [vmem:[%s1721_s6 + $0x30] sm:$0xff]  ;;  %v394_v5 = vld [vmem:[%s1721_s6 + $0x28] sm:$0xff]  ;;  %vm462_vm1 = vcmask 523264   ;;  %vm495_vm2 = vcmask 7168   ;;  %s2077_s7 = sld [smem:[#allocation15_spill]] }
  0x69   : > { %v519_v2 = vld [vmem:[%s1733_s27 + $0x38] sm:$0xff]  ;;  %405 = vmatpush.xpose.msra.mxu0 %v396_v1  ;;  %v518_v4 = vld [vmem:[%s1733_s27 + $0x30] sm:$0xff]  ;;  %1077 = vmatpush.xpose.msra.mxu2 %v396_v1  ;;  %v517_v6 = vld [vmem:[%s1733_s27 + $0x28] sm:$0xff]  ;;  %s2078_s4 = sld [smem:[#allocation16_spill]] }
  0x6a   : > { %1085 = vmatpush.xpose.msra.mxu3 %v519_v2  ;;  %528 = vmatpush.xpose.msra.mxu1 %v519_v2  ;;  %v393_v7 = vld [vmem:[%s1721_s6 + $0x20] sm:$0xff]  ;;  %v392_v9 = vld [vmem:[%s1721_s6 + $0x18] sm:$0xff]  ;;  %v391_v11 = vld [vmem:[%s1721_s6 + $0x10] sm:$0xff] }
  0x6b   : > { %v516_v8 = vld [vmem:[%s1733_s27 + $0x20] sm:$0xff]  ;;  %v515_v10 = vld [vmem:[%s1733_s27 + $0x18] sm:$0xff]  ;;  %v514_v12 = vld [vmem:[%s1733_s27 + $0x10] sm:$0xff] }
  0x6c   : > { %v390_v13 = vld [vmem:[%s1721_s6 + $0x8] sm:$0xff]  ;;  %v389_v15 = vld [vmem:[%s1721_s6] sm:$0xff]  ;;  %v1799_v25 = vld [vmem:[%s1712_s14 + $0x10] sm:$0xff] }
  0x6d   : > { %406 = vmatpush.xpose.msra.mxu0 %v395_v3  ;;  %1078 = vmatpush.xpose.msra.mxu2 %v395_v3  ;;  %v513_v14 = vld [vmem:[%s1733_s27 + $0x8] sm:$0xff]  ;;  %v512_v16 = vld [vmem:[%s1733_s27] sm:$0xff]  ;;  %v510_v26 = vld [vmem:[%s1727_s15 + $0x30] sm:$0xff] }
  0x6e   : > { %1086 = vmatpush.xpose.msra.mxu3 %v518_v4  ;;  %529 = vmatpush.xpose.msra.mxu1 %v518_v4  ;;  %v1779_v17 = vld [vmem:[%s1712_s14] sm:$0xff]  ;;  %v1789_v21 = vld [vmem:[%s1712_s14 + $0x8] sm:$0xff]  ;;  %v506_v27 = vld [vmem:[%s1727_s15 + $0x10] sm:$0xff] }
  0x6f   : > { %v508_v18 = vld [vmem:[%s1727_s15 + $0x20] sm:$0xff]  ;;  %v509_v22 = vld [vmem:[%s1727_s15 + $0x28] sm:$0xff]  ;;  %v1804_v28 = vld [vmem:[%s1712_s14 + $0x30] sm:$0xff]  ;;  %p1053_p7 = scmp.ne.s32.totalorder %s2078_s4, %s2077_s7 }
  0x70   : > { %v504_v19 = vld [vmem:[%s1727_s15] sm:$0xff]  ;;  %v505_v23 = vld [vmem:[%s1727_s15 + $0x8] sm:$0xff]  ;;  %v1809_v29 = vld [vmem:[%s1712_s14 + $0x18] sm:$0xff] }
  0x71   : > { %407 = vmatpush.xpose.msra.mxu0 %v394_v5  ;;  %1079 = vmatpush.xpose.msra.mxu2 %v394_v5  ;;  %v1784_v20 = vld [vmem:[%s1712_s14 + $0x20] sm:$0xff]  ;;  %v1794_v24 = vld [vmem:[%s1712_s14 + $0x28] sm:$0xff]  ;;  %v511_v30 = vld [vmem:[%s1727_s15 + $0x38] sm:$0xff] }
  0x72   : > { %1087 = vmatpush.xpose.msra.mxu3 %v517_v6  ;;  %530 = vmatpush.xpose.msra.mxu1 %v517_v6  ;;  %v507_v31 = vld [vmem:[%s1727_s15 + $0x18] sm:$0xff] }
  0x73   : > { %v1814_v32 = vld [vmem:[%s1712_s14 + $0x38] sm:$0xff] }
  0x75   : > { %408 = vmatpush.xpose.msra.mxu0 %v393_v7  ;;  %1080 = vmatpush.xpose.msra.mxu2 %v393_v7 }
  0x76   : > { %1088 = vmatpush.xpose.msra.mxu3 %v516_v8  ;;  %531 = vmatpush.xpose.msra.mxu1 %v516_v8 }
  0x79   : > { %409 = vmatpush.xpose.msra.mxu0 %v392_v9  ;;  %1081 = vmatpush.xpose.msra.mxu2 %v392_v9 }
  0x7a   : > { %1089 = vmatpush.xpose.msra.mxu3 %v515_v10  ;;  %532 = vmatpush.xpose.msra.mxu1 %v515_v10 }
  0x7d   : > { %410 = vmatpush.xpose.msra.mxu0 %v391_v11  ;;  %1082 = vmatpush.xpose.msra.mxu2 %v391_v11 }
  0x7e   : > { %1090 = vmatpush.xpose.msra.mxu3 %v514_v12  ;;  %533 = vmatpush.xpose.msra.mxu1 %v514_v12 }
  0x81   : > { %411 = vmatpush.xpose.msra.mxu0 %v390_v13  ;;  %1083 = vmatpush.xpose.msra.mxu2 %v390_v13 }
  0x82   : > { %1091 = vmatpush.xpose.msra.mxu3 %v513_v14  ;;  %534 = vmatpush.xpose.msra.mxu1 %v513_v14 }
  0x85   : > { %412 = vmatpush.xpose.msra.mxu0 %v389_v15  ;;  %1084 = vmatpush.xpose.msra.mxu2 %v389_v15 }
  0x86   : > { %1092 = vmatpush.xpose.msra.mxu3 %v512_v16  ;;  %535 = vmatpush.xpose.msra.mxu1 %v512_v16 }
  0x88   : > { %413 = vmatmul.f32.vlgmr.msra.gmra.mxu0 %v1779_v17  ;;  %425 = vmatmul.f32.vlgmr.msra.gmra.mxu2 %v1784_v20 }
  0x89   : > { %548 = vmatmul.f32.vlgmr.msra.gmra.mxu3 %v508_v18  ;;  %536 = vmatmul.f32.vlgmr.msra.gmra.mxu1 %v504_v19 }
  0x90   : > { %416 = vmatmul.f32.gmra.mxu0 %v1789_v21  ;;  %428 = vmatmul.f32.gmra.mxu2 %v1794_v24 }
  0x91   : > { %551 = vmatmul.f32.gmra.mxu3 %v509_v22  ;;  %539 = vmatmul.f32.gmra.mxu1 %v505_v23 }
  0x98   : > { %419 = vmatmul.f32.gmra.mxu0 %v1799_v25  ;;  %431 = vmatmul.f32.gmra.mxu2 %v1804_v28 }
  0x99   : > { %554 = vmatmul.f32.gmra.mxu3 %v510_v26  ;;  %542 = vmatmul.f32.gmra.mxu1 %v506_v27 }
  0xa0   : > { %422 = vmatmul.f32.gmra.mxu0 %v1809_v29  ;;  %434 = vmatmul.f32.gmra.mxu2 %v1814_v32 }
  0xa1   : > { %557 = vmatmul.f32.gmra.mxu3 %v511_v30  ;;  %545 = vmatmul.f32.gmra.mxu1 %v507_v31 }
 0x105   : > { %v414_v33 = vpop.f32.mrf.mxu0 }
 0x106   : > { %v438_v34 = vmul.f32 1.442695, %v414_v33  ;;  %v537_v35 = vpop.f32.mrf.mxu1 }
 0x107   : > { %v561_v36 = vmul.f32 1.442695, %v537_v35 }
 0x108   : > { %1206 = vpow2.f32 %v438_v34 }
 0x109   : > { %1208 = vpow2.f32 %v561_v36 }
 0x10b   : > { %v426_v39 = vpop.f32.mrf.mxu2 }
 0x10c   : > { %v549_v37 = vpop.f32.mrf.mxu3  ;;  %v446_v41 = vmul.f32 1.442695, %v426_v39 }
 0x10d   : > { %v569_v38 = vmul.f32 1.442695, %v549_v37  ;;  %v417_v40 = vpop.f32.mrf.mxu0 }
 0x10e   : > { %v1818_v42 = vpop.eup %1206  ;;  %v540_v43 = vpop.f32.mrf.mxu1  ;;  %v440_v47 = vmul.f32 1.442695, %v417_v40 }
 0x10f   : > { %1210 = vpow2.f32 %v569_v38  ;;  %v1820_v44 = vpop.eup %1208  ;;  %v463_v45 = vsel %vm462_vm1, %v1818_v42, 0.0  ;;  %v563_v59 = vmul.f32 1.442695, %v540_v43  ;;  %v577_v43 = vld [vmem:[#allocation3] sm:$0xff] }
 0x110   : > { %1212 = vpow2.f32 %v446_v41  ;;  %464 = vadd.xlane.f32.xlu0 %v463_v45  ;;  %v585_v46 = vsel %vm462_vm1, %v1820_v44, 0.0  ;;  %v454_v41 = vld [vmem:[#allocation2] sm:$0xff] }
 0x111   : > { %586 = vadd.xlane.f32.xlu2 %v585_v46  ;;  %1214 = vpow2.f32 %v440_v47 }
 0x113   : > { %v429_v50 = vpop.f32.mrf.mxu2 }
 0x114   : > { %v1826_v48 = vpop.f32.mrf.mxu3  ;;  %v448_v54 = vmul.f32 1.442695, %v429_v50  ;;  %v581_v50 = vld [vmem:[#allocation3 + $0x20] sm:$0xff] }
 0x115   : > { %v1828_v49 = vpop.eup %1210  ;;  %v420_v52 = vpop.f32.mrf.mxu0  ;;  %v571_v36 = vmul.f32 1.442695, %v1826_v48 }
 0x116   : > { %v1830_v51 = vpop.eup %1212  ;;  %v597_v53 = vsel %vm462_vm1, %v1828_v49, 0.0  ;;  %v442_v55 = vmul.f32 1.442695, %v420_v52  ;;  %v543_v56 = vpop.f32.mrf.mxu1  ;;  %1216 = vpow2.f32 %v448_v54  ;;  %v458_v52 = vld [vmem:[#allocation2 + $0x20] sm:$0xff] }
 0x117   : > { %v475_v57 = vsel %vm462_vm1, %v1830_v51, 0.0  ;;  %v565_v58 = vmul.f32 1.442695, %v543_v56  ;;  %v1836_v61 = vpop.eup %1214 }
 0x118   : > { %1218 = vpow2.f32 %v442_v55  ;;  %598 = vadd.xlane.f32.xlu0 %v597_v53  ;;  %v466_v4 = vsel %vm462_vm1, %v1836_v61, 0.0 }
 0x119   : > { %476 = vadd.xlane.f32.xlu2 %v475_v57  ;;  %1220 = vpow2.f32 %v565_v58  ;;  %v455_v57 = vld [vmem:[#allocation2 + $0x8] sm:$0xff]  ;;  %v456_v58 = vld [vmem:[#allocation2 + $0x10] sm:$0xff] }
 0x11a   : > { %1222 = vpow2.f32 %v563_v59  ;;  %v459_v59 = vld [vmem:[#allocation2 + $0x28] sm:$0xff] }
 0x11b   : > { %v432_v62 = vpop.f32.mrf.mxu2 }
 0x11c   : > { %v555_v60 = vpop.f32.mrf.mxu3  ;;  %v1838_v63 = vpop.eup %1216  ;;  %v450_v6 = vmul.f32 1.442695, %v432_v62 }
 0x11d   : > { %v423_v0 = vpop.f32.mrf.mxu0  ;;  %v478_v3 = vsel %vm462_vm1, %v1838_v63, 0.0  ;;  %v573_v9 = vmul.f32 1.442695, %v555_v60 }
 0x11e   : > { %v1840_v1 = vpop.eup %1218  ;;  %v546_v2 = vpop.f32.mrf.mxu1  ;;  %v444_v8 = vmul.f32 1.442695, %v423_v0 }
 0x11f   : > { %v469_v5 = vsel %vm462_vm1, %v1840_v1, 0.0  ;;  %v567_v7 = vmul.f32 1.442695, %v546_v2  ;;  %v1848_v10 = vpop.eup %1220 }
 0x120   : > { %467 = vadd.xlane.f32.xlu0 %v466_v4  ;;  %470 = vadd.xlane.f32.xlu1 %v469_v5  ;;  %v1850_v11 = vpop.eup %1222  ;;  %v591_v13 = vsel %vm462_vm1, %v1848_v10, 0.0  ;;  %v578_v5 = vld [vmem:[#allocation3 + $0x8] sm:$0xff] }
 0x121   : > { %1224 = vpow2.f32 %v567_v7  ;;  %479 = vadd.xlane.f32.xlu2 %v478_v3  ;;  %v588_v16 = vsel %vm462_vm1, %v1850_v11, 0.0  ;;  %v580_v7 = vld [vmem:[#allocation3 + $0x18] sm:$0xff] }
 0x122   : > { %1226 = vpow2.f32 %v450_v6  ;;  %v579_v6 = vld [vmem:[#allocation3 + $0x10] sm:$0xff] }
 0x123   : > { %1228 = vpow2.f32 %v444_v8  ;;  %v435_v14 = vpop.f32.mrf.mxu2 }
 0x124   : > { %v558_v12 = vpop.f32.mrf.mxu3  ;;  %1230 = vpow2.f32 %v573_v9  ;;  %v452_v19 = vmul.f32 1.442695, %v435_v14 }
 0x125   : > { %v575_v18 = vmul.f32 1.442695, %v558_v12 }
 0x127   : > { %v1854_v15 = vpop.eup %1224  ;;  %1232 = vpow2.f32 %v575_v18  ;;  %v460_v18 = vld [vmem:[#allocation2 + $0x30] sm:$0xff] }
 0x128   : > { %589 = vadd.xlane.f32.xlu0 %v588_v16  ;;  %592 = vadd.xlane.f32.xlu1 %v591_v13  ;;  %v594_v22 = vsel %vm462_vm1, %v1854_v15, 0.0  ;;  %v1860_v23 = vpop.eup %1226  ;;  %1234 = vpow2.f32 %v452_v19  ;;  %v457_v19 = vld [vmem:[#allocation2 + $0x18] sm:$0xff] }
 0x129   : > { %595 = vadd.xlane.f32.xlu2 %v594_v22  ;;  %v1862_v26 = vpop.eup %1228  ;;  %v481_v30 = vsel %vm462_vm1, %v1860_v23, 0.0  ;;  %1236 = vpow2.f32 %v571_v36  ;;  %v583_v22 = vld [vmem:[#allocation3 + $0x30] sm:$0xff] }
 0x12a   : > { %v1864_v27 = vpop.eup %1230  ;;  %v472_v31 = vsel %vm462_vm1, %v1862_v26, 0.0 }
 0x12b   : > { %v603_v33 = vsel %vm462_vm1, %v1864_v27, 0.0 }
 0x12d   : > { %v1872_v34 = vpop.eup %1232 }
 0x12e   : > { %v1874_v35 = vpop.eup %1234  ;;  %v606_v38 = vsel %vm462_vm1, %v1872_v34, 0.0 }
 0x12f   : > { %v484_v37 = vsel %vm462_vm1, %v1874_v35, 0.0  ;;  %v1881_v39 = vpop.eup %1236 }
 0x130   : > { %482 = vadd.xlane.f32.xlu0 %v481_v30  ;;  %473 = vadd.xlane.f32.xlu1 %v472_v31  ;;  %v600_v40 = vsel %vm462_vm1, %v1881_v39, 0.0 }
 0x131   : > { %604 = vadd.xlane.f32.xlu2 %v603_v33 }
 0x138   : > { %485 = vadd.xlane.f32.xlu1 %v484_v37  ;;  %607 = vadd.xlane.f32.xlu0 %v606_v38 }
 0x140   : > { %601 = vadd.xlane.f32.xlu1 %v600_v40  ;;  %v461_v40 = vld [vmem:[#allocation2 + $0x38] sm:$0xff] }
 0x183   : > { %v465_v45 = vpop.xlane.xlu0 %464 }
 0x184   : > { %v487_v46 = vadd.f32 %v465_v45, %v454_v41  ;;  %v587_v47 = vpop.xlane.xlu2 %586  ;;  %v584_v41 = vld [vmem:[#allocation3 + $0x38] sm:$0xff] }
 0x185   : > { %v609_v48 = vadd.f32 %v587_v47, %v577_v43 }
 0x186   : > { %496 = vst.msk [vmem:[#allocation2] sm:$0xff] %vm495_vm2, %v487_v46 }
 0x187   : > { %617 = vst.msk [vmem:[#allocation3] sm:$0xff] %vm495_vm2, %v609_v48  ;;  %v582_v48 = vld [vmem:[#allocation3 + $0x28] sm:$0xff] }
 0x18b   : > { %v599_v53 = vpop.xlane.xlu0 %598 }
 0x18c   : > { %v613_v54 = vadd.f32 %v599_v53, %v581_v50  ;;  %v477_v55 = vpop.xlane.xlu2 %476 }
 0x18d   : > { %v491_v56 = vadd.f32 %v477_v55, %v458_v52 }
 0x18e   : > { %621 = vst.msk [vmem:[#allocation3 + $0x20] sm:$0xff] %vm495_vm2, %v613_v54 }
 0x18f   : > { %500 = vst.msk [vmem:[#allocation2 + $0x20] sm:$0xff] %vm495_vm2, %v491_v56 }
 0x193   : > { %v468_v60 = vpop.xlane.xlu0 %467  ;;  %v471_v62 = vpop.xlane.xlu1 %470 }
 0x194   : > { %v488_v0 = vadd.f32 %v468_v60, %v455_v57  ;;  %v489_v2 = vadd.f32 %v471_v62, %v456_v58  ;;  %v480_v3 = vpop.xlane.xlu2 %479 }
 0x195   : > { %v492_v4 = vadd.f32 %v480_v3, %v459_v59 }
 0x196   : > { %497 = vst.msk [vmem:[#allocation2 + $0x8] sm:$0xff] %vm495_vm2, %v488_v0 }
 0x197   : > { %498 = vst.msk [vmem:[#allocation2 + $0x10] sm:$0xff] %vm495_vm2, %v489_v2 }
 0x198   : > { %501 = vst.msk [vmem:[#allocation2 + $0x28] sm:$0xff] %vm495_vm2, %v492_v4 }
 0x19b   : > { %v590_v8 = vpop.xlane.xlu0 %589  ;;  %v593_v9 = vpop.xlane.xlu1 %592 }
 0x19c   : > { %v610_v12 = vadd.f32 %v590_v8, %v578_v5  ;;  %v611_v13 = vadd.f32 %v593_v9, %v579_v6  ;;  %v596_v14 = vpop.xlane.xlu2 %595 }
 0x19d   : > { %v612_v16 = vadd.f32 %v596_v14, %v580_v7 }
 0x19e   : > { %618 = vst.msk [vmem:[#allocation3 + $0x8] sm:$0xff] %vm495_vm2, %v610_v12 }
 0x19f   : > { %619 = vst.msk [vmem:[#allocation3 + $0x10] sm:$0xff] %vm495_vm2, %v611_v13 }
 0x1a0   : > { %620 = vst.msk [vmem:[#allocation3 + $0x18] sm:$0xff] %vm495_vm2, %v612_v16 }
 0x1a3   : > { %v483_v30 = vpop.xlane.xlu0 %482  ;;  %v474_v31 = vpop.xlane.xlu1 %473 }
 0x1a4   : > { %v493_v33 = vadd.f32 %v483_v30, %v460_v18  ;;  %v490_v36 = vadd.f32 %v474_v31, %v457_v19  ;;  %v605_v37 = vpop.xlane.xlu2 %604 }
 0x1a5   : > { %v615_v38 = vadd.f32 %v605_v37, %v583_v22 }
 0x1a6   : > { %502 = vst.msk [vmem:[#allocation2 + $0x30] sm:$0xff] %vm495_vm2, %v493_v33 }
 0x1a7   : > { %499 = vst.msk [vmem:[#allocation2 + $0x18] sm:$0xff] %vm495_vm2, %v490_v36 }
 0x1a8   : > { %623 = vst.msk [vmem:[#allocation3 + $0x30] sm:$0xff] %vm495_vm2, %v615_v38 }
 0x1ab   : > { %v486_v43 = vpop.xlane.xlu1 %485  ;;  %v608_v45 = vpop.xlane.xlu0 %607 }
 0x1ac   : > { %v494_v46 = vadd.f32 %v486_v43, %v461_v40  ;;  %v616_v47 = vadd.f32 %v608_v45, %v584_v41 }
 0x1ae   : > { %503 = vst.msk [vmem:[#allocation2 + $0x38] sm:$0xff] %vm495_vm2, %v494_v46 }
 0x1af   : > { %624 = vst.msk [vmem:[#allocation3 + $0x38] sm:$0xff] %vm495_vm2, %v616_v47 }
 0x1b2   : > { %628 = sbr.rel (%p1053_p7) target bundleno = 605 (0x25d), region = 60 }
 0x1b3   : > { %v602_v50 = vpop.xlane.xlu1 %601 }
 0x1b4   : > { %v614_v52 = vadd.f32 %v602_v50, %v582_v48 }
 0x1b6   : > { %622 = vst.msk [vmem:[#allocation3 + $0x28] sm:$0xff] %vm495_vm2, %v614_v52 }
 0x1b7   : > { %v629_v53 = vlaneseq  ;;  %v648_v37 = vld [vmem:[#allocation2] sm:$0xff]  ;;  %v650_v40 = vld [vmem:[#allocation2 + $0x10] sm:$0xff]  ;;  %v649_v47 = vld [vmem:[#allocation2 + $0x8] sm:$0xff] }
 0x1b8   : > { %v652_v38 = vld [vmem:[#allocation2 + $0x20] sm:$0xff]  ;;  %v653_v48 = vld [vmem:[#allocation2 + $0x28] sm:$0xff]  ;;  %v651_v50 = vld [vmem:[#allocation2 + $0x18] sm:$0xff] }
 0x1b9   : > { %v630_v54 = vshrl.u32 %v629_v53, 7  ;;  %v639_v55 = vand.u32 127, %v629_v53 }
 0x1bb   : > { %vm640_vm3 = vcmp.eq.s32.totalorder %v630_v54, %v639_v55  ;;  %v634_v56 = vadd.s32 32, %v630_v54  ;;  %v632_v57 = vadd.s32 16, %v630_v54  ;;  %v631_v58 = vadd.s32 8, %v630_v54 }
 0x1bc   : > { %v656_v59 = vsel %vm640_vm3, %v1818_v42, 0.0  ;;  %v635_v60 = vadd.s32 40, %v630_v54  ;;  %v633_v62 = vadd.s32 24, %v630_v54  ;;  %v636_v6 = vadd.s32 48, %v630_v54 }
 0x1bd   : > { %v664_v0 = vsel %vm462_vm1, %v656_v59, 0.0  ;;  %vm644_vm4 = vcmp.eq.s32.totalorder %v634_v56, %v639_v55  ;;  %vm642_vm5 = vcmp.eq.s32.totalorder %v632_v57, %v639_v55  ;;  %vm641_vm6 = vcmp.eq.s32.totalorder %v631_v58, %v639_v55  ;;  %v654_v57 = vld [vmem:[#allocation2 + $0x30] sm:$0xff]  ;;  %v704_v59 = vld [vmem:[#allocation3] sm:$0xff] }
 0x1be   : > { %665 = vadd.xlane.f32.xlu0 %v664_v0  ;;  %v660_v2 = vsel %vm644_vm4, %v1830_v51, 0.0  ;;  %v658_v3 = vsel %vm642_vm5, %v1840_v1, 0.0  ;;  %vm645_vm7 = vcmp.eq.s32.totalorder %v635_v60, %v639_v55  ;;  %v657_v42 = vsel %vm641_vm6, %v1836_v61, 0.0  ;;  %v655_v60 = vld [vmem:[#allocation2 + $0x38] sm:$0xff] }
 0x1bf   : > { %v676_v4 = vsel %vm462_vm1, %v660_v2, 0.0  ;;  %v670_v5 = vsel %vm462_vm1, %v658_v3, 0.0  ;;  %vm643_vm8 = vcmp.eq.s32.totalorder %v633_v62, %v639_v55  ;;  %v661_v7 = vsel %vm645_vm7, %v1838_v63, 0.0 }
 0x1c0   : > { %677 = vadd.xlane.f32.xlu2 %v676_v4  ;;  %671 = vadd.xlane.f32.xlu1 %v670_v5  ;;  %v659_v51 = vsel %vm643_vm8, %v1862_v26, 0.0  ;;  %v667_v1 = vsel %vm462_vm1, %v657_v42, 0.0  ;;  %v637_v8 = vadd.s32 56, %v630_v54  ;;  %v679_v9 = vsel %vm462_vm1, %v661_v7, 0.0  ;;  %v705_v5 = vld [vmem:[#allocation3 + $0x8] sm:$0xff]  ;;  %v706_v7 = vld [vmem:[#allocation3 + $0x10] sm:$0xff] }
 0x1c1   : > { %v673_v12 = vsel %vm462_vm1, %v659_v51, 0.0  ;;  %vm646_vm9 = vcmp.eq.s32.totalorder %v636_v6, %v639_v55  ;;  %v712_v63 = vsel %vm640_vm3, %v1820_v44, 0.0  ;;  %v713_v18 = vsel %vm641_vm6, %v1850_v11, 0.0  ;;  %v707_v6 = vld [vmem:[#allocation3 + $0x18] sm:$0xff] }
 0x1c2   : > { %vm647_vm10 = vcmp.eq.s32.totalorder %v637_v8, %v639_v55  ;;  %v662_v61 = vsel %vm646_vm9, %v1860_v23, 0.0  ;;  %v720_v14 = vsel %vm462_vm1, %v712_v63, 0.0  ;;  %v715_v23 = vsel %vm643_vm8, %v1854_v15, 0.0 }
 0x1c3   : > { %v663_v26 = vsel %vm647_vm10, %v1874_v35, 0.0  ;;  %v682_v13 = vsel %vm462_vm1, %v662_v61, 0.0  ;;  %v714_v44 = vsel %vm642_vm5, %v1848_v10, 0.0  ;;  %v723_v35 = vsel %vm462_vm1, %v713_v18, 0.0  ;;  %v708_v61 = vld [vmem:[#allocation3 + $0x20] sm:$0xff] }
 0x1c4   : > { %v685_v16 = vsel %vm462_vm1, %v663_v26, 0.0  ;;  %v729_v19 = vsel %vm462_vm1, %v715_v23, 0.0  ;;  %v726_v22 = vsel %vm462_vm1, %v714_v44, 0.0  ;;  %v716_v30 = vsel %vm644_vm4, %v1828_v49, 0.0  ;;  %v710_v26 = vld [vmem:[#allocation3 + $0x30] sm:$0xff] }
 0x1c5   : > { %v718_v11 = vsel %vm646_vm9, %v1864_v27, 0.0  ;;  %v717_v15 = vsel %vm645_vm7, %v1881_v39, 0.0  ;;  %v732_v10 = vsel %vm462_vm1, %v716_v30, 0.0  ;;  %v719_v36 = vsel %vm647_vm10, %v1872_v34, 0.0 }
 0x1c6   : > { %668 = vadd.xlane.f32.xlu0 %v667_v1  ;;  %v738_v31 = vsel %vm462_vm1, %v718_v11, 0.0  ;;  %v735_v33 = vsel %vm462_vm1, %v717_v15, 0.0  ;;  %v741_v49 = vsel %vm462_vm1, %v719_v36, 0.0 }
 0x1c8   : > { %680 = vadd.xlane.f32.xlu2 %v679_v9  ;;  %674 = vadd.xlane.f32.xlu1 %v673_v12 }
 0x1ce   : > { %683 = vadd.xlane.f32.xlu0 %v682_v13  ;;  %v709_v13 = vld [vmem:[#allocation3 + $0x28] sm:$0xff] }
 0x1d0   : > { %721 = vadd.xlane.f32.xlu2 %v720_v14  ;;  %686 = vadd.xlane.f32.xlu1 %v685_v16 }
 0x1d6   : > { %724 = vadd.xlane.f32.xlu0 %v723_v35  ;;  %v711_v35 = vld [vmem:[#allocation3 + $0x38] sm:$0xff] }
 0x1d8   : > { %730 = vadd.xlane.f32.xlu2 %v729_v19  ;;  %727 = vadd.xlane.f32.xlu1 %v726_v22 }
 0x1de   : > { %733 = vadd.xlane.f32.xlu0 %v732_v10 }
 0x1e0   : > { %739 = vadd.xlane.f32.xlu2 %v738_v31  ;;  %736 = vadd.xlane.f32.xlu1 %v735_v33 }
 0x1e6   : > { %742 = vadd.xlane.f32.xlu0 %v741_v49 }
 0x231   : > { %v666_v27 = vpop.xlane.xlu0 %665 }
 0x232   : > { %v688_v39 = vsub.f32 %v648_v37, %v666_v27 }
 0x233   : > { %v678_v41 = vpop.xlane.xlu2 %677  ;;  %v672_v43 = vpop.xlane.xlu1 %671 }
 0x234   : > { %696 = vst.msk [vmem:[#allocation2] sm:$0xff] %vm495_vm2, %v688_v39  ;;  %v692_v45 = vsub.f32 %v652_v38, %v678_v41  ;;  %v690_v46 = vsub.f32 %v650_v40, %v672_v43 }
 0x236   : > { %700 = vst.msk [vmem:[#allocation2 + $0x20] sm:$0xff] %vm495_vm2, %v692_v45 }
 0x237   : > { %698 = vst.msk [vmem:[#allocation2 + $0x10] sm:$0xff] %vm495_vm2, %v690_v46 }
 0x239   : > { %v669_v34 = vpop.xlane.xlu0 %668 }
 0x23a   : > { %v689_v52 = vsub.f32 %v649_v47, %v669_v34 }
 0x23b   : > { %v681_v53 = vpop.xlane.xlu2 %680  ;;  %v675_v54 = vpop.xlane.xlu1 %674 }
 0x23c   : > { %697 = vst.msk [vmem:[#allocation2 + $0x8] sm:$0xff] %vm495_vm2, %v689_v52  ;;  %v693_v55 = vsub.f32 %v653_v48, %v681_v53  ;;  %v691_v56 = vsub.f32 %v651_v50, %v675_v54 }
 0x23e   : > { %701 = vst.msk [vmem:[#allocation2 + $0x28] sm:$0xff] %vm495_vm2, %v693_v55 }
 0x23f   : > { %699 = vst.msk [vmem:[#allocation2 + $0x18] sm:$0xff] %vm495_vm2, %v691_v56 }
 0x241   : > { %v684_v58 = vpop.xlane.xlu0 %683 }
 0x242   : > { %v694_v62 = vsub.f32 %v654_v57, %v684_v58 }
 0x243   : > { %v722_v0 = vpop.xlane.xlu2 %721  ;;  %v687_v2 = vpop.xlane.xlu1 %686 }
 0x244   : > { %702 = vst.msk [vmem:[#allocation2 + $0x30] sm:$0xff] %vm495_vm2, %v694_v62  ;;  %v744_v3 = vsub.f32 %v704_v59, %v722_v0  ;;  %v695_v4 = vsub.f32 %v655_v60, %v687_v2 }
 0x246   : > { %752 = vst.msk [vmem:[#allocation3] sm:$0xff] %vm495_vm2, %v744_v3 }
 0x247   : > { %703 = vst.msk [vmem:[#allocation2 + $0x38] sm:$0xff] %vm495_vm2, %v695_v4 }
 0x249   : > { %v725_v42 = vpop.xlane.xlu0 %724 }
 0x24a   : > { %v745_v51 = vsub.f32 %v705_v5, %v725_v42 }
 0x24b   : > { %v731_v1 = vpop.xlane.xlu2 %730  ;;  %v728_v8 = vpop.xlane.xlu1 %727 }
 0x24c   : > { %753 = vst.msk [vmem:[#allocation3 + $0x8] sm:$0xff] %vm495_vm2, %v745_v51  ;;  %v747_v9 = vsub.f32 %v707_v6, %v731_v1  ;;  %v746_v12 = vsub.f32 %v706_v7, %v728_v8 }
 0x24e   : > { %755 = vst.msk [vmem:[#allocation3 + $0x18] sm:$0xff] %vm495_vm2, %v747_v9 }
 0x24f   : > { %754 = vst.msk [vmem:[#allocation3 + $0x10] sm:$0xff] %vm495_vm2, %v746_v12 }
 0x251   : > { %v734_v63 = vpop.xlane.xlu0 %733 }
 0x252   : > { %v748_v14 = vsub.f32 %v708_v61, %v734_v63 }
 0x253   : > { %v740_v16 = vpop.xlane.xlu2 %739  ;;  %v737_v18 = vpop.xlane.xlu1 %736 }
 0x254   : > { %756 = vst.msk [vmem:[#allocation3 + $0x20] sm:$0xff] %vm495_vm2, %v748_v14  ;;  %v750_v23 = vsub.f32 %v710_v26, %v740_v16  ;;  %v749_v44 = vsub.f32 %v709_v13, %v737_v18 }
 0x256   : > { %758 = vst.msk [vmem:[#allocation3 + $0x30] sm:$0xff] %vm495_vm2, %v750_v23 }
 0x257   : > { %757 = vst.msk [vmem:[#allocation3 + $0x28] sm:$0xff] %vm495_vm2, %v749_v44 }
 0x259   : > { %v743_v19 = vpop.xlane.xlu0 %742 }
 0x25a   : > { %v751_v22 = vsub.f32 %v711_v35, %v743_v19 }
 0x25c   : > { %759 = vst.msk [vmem:[#allocation3 + $0x38] sm:$0xff] %vm495_vm2, %v751_v22 }
 0x25d PF: > { %s2079_s13 = sld [smem:[#allocation15_spill]] }
 0x263   : > { %p1054_p9 = scmp.ne.s32.totalorder %s2079_s13, 1 }
 0x265   : > { %763 = sbr.rel (%p1054_p9) target bundleno = 757 (0x2f5), region = 64 }
 0x26a   : > { %v766_v30 = vld [vmem:[%s1727_s15 + $0x10] sm:$0xff]  ;;  %v764_v11 = vld [vmem:[%s1727_s15] sm:$0xff]  ;;  %v767_v36 = vld [vmem:[%s1727_s15 + $0x18] sm:$0xff] }
 0x26b   : > { %v768_v15 = vld [vmem:[%s1727_s15 + $0x20] sm:$0xff]  ;;  %v774_v10 = vmul.f32 %v766_v30, %v1799_v25  ;;  %v772_v31 = vmul.f32 %v764_v11, %v1779_v17  ;;  %v765_v49 = vld [vmem:[%s1727_s15 + $0x8] sm:$0xff]  ;;  %v775_v27 = vmul.f32 %v767_v36, %v1809_v29  ;;  %v771_v25 = vld [vmem:[%s1727_s15 + $0x38] sm:$0xff] }
 0x26c   : > { %v776_v33 = vmul.f32 %v768_v15, %v1784_v20  ;;  %v769_v37 = vld [vmem:[%s1727_s15 + $0x28] sm:$0xff]  ;;  %v773_v38 = vmul.f32 %v765_v49, %v1789_v21  ;;  %v770_v39 = vld [vmem:[%s1727_s15 + $0x30] sm:$0xff]  ;;  %v779_v17 = vmul.f32 %v771_v25, %v1814_v32  ;;  %v796_v45 = vld [vmem:[#allocation2] sm:$0xff] }
 0x26d   : > { %784 = vadd.xlane.f32.xlu1 %v774_v10  ;;  %780 = vadd.xlane.f32.xlu0 %v772_v31  ;;  %v777_v40 = vmul.f32 %v769_v37, %v1794_v24  ;;  %v778_v20 = vmul.f32 %v770_v39, %v1804_v28  ;;  %v798_v41 = vld [vmem:[#allocation2 + $0x10] sm:$0xff]  ;;  %v828_v29 = vld [vmem:[#allocation3] sm:$0xff]  ;;  %v1055_v34 = vadd.f32 -28.0, %v796_v45  ;;  %v799_v53 = vld [vmem:[#allocation2 + $0x18] sm:$0xff] }
 0x26e   : > { %788 = vadd.xlane.f32.xlu2 %v776_v33  ;;  %v830_v43 = vld [vmem:[#allocation3 + $0x10] sm:$0xff]  ;;  %v1057_v46 = vadd.f32 -28.0, %v798_v41  ;;  %v800_v21 = vld [vmem:[#allocation2 + $0x20] sm:$0xff]  ;;  %v1063_v48 = vadd.f32 -28.0, %v828_v29  ;;  %v831_v32 = vld [vmem:[#allocation3 + $0x18] sm:$0xff]  ;;  %v1058_v54 = vadd.f32 -28.0, %v799_v53 }
 0x26f   : > { %v1065_v47 = vadd.f32 -28.0, %v830_v43  ;;  %v832_v24 = vld [vmem:[#allocation3 + $0x20] sm:$0xff]  ;;  %v1059_v50 = vadd.f32 -28.0, %v800_v21  ;;  %v797_v28 = vld [vmem:[#allocation2 + $0x8] sm:$0xff]  ;;  %v1066_v56 = vadd.f32 -28.0, %v831_v32  ;;  %v803_v6 = vld [vmem:[#allocation2 + $0x38] sm:$0xff] }
 0x270   : > { %1238 = vlog2.f32 %v1057_v46  ;;  %v1067_v52 = vadd.f32 -28.0, %v832_v24  ;;  %v829_v55 = vld [vmem:[#allocation3 + $0x8] sm:$0xff]  ;;  %v1056_v59 = vadd.f32 -28.0, %v797_v28  ;;  %v835_v51 = vld [vmem:[#allocation3 + $0x38] sm:$0xff]  ;;  %v802_v9 = vld [vmem:[#allocation2 + $0x30] sm:$0xff]  ;;  %v1062_v63 = vadd.f32 -28.0, %v803_v6 }
 0x271   : > { %1240 = vlog2.f32 %v1065_v47  ;;  %v801_v57 = vld [vmem:[#allocation2 + $0x28] sm:$0xff]  ;;  %v1064_v0 = vadd.f32 -28.0, %v829_v55  ;;  %v834_v26 = vld [vmem:[#allocation3 + $0x30] sm:$0xff]  ;;  %v1070_v18 = vadd.f32 -28.0, %v835_v51  ;;  %v1061_v44 = vadd.f32 -28.0, %v802_v9 }
 0x272   : > { %1242 = vlog2.f32 %v1055_v34  ;;  %v833_v60 = vld [vmem:[#allocation3 + $0x28] sm:$0xff]  ;;  %v1060_v3 = vadd.f32 -28.0, %v801_v57  ;;  %v1069_v19 = vadd.f32 -28.0, %v834_v26 }
 0x273   : > { %1244 = vlog2.f32 %v1063_v48  ;;  %v1068_v5 = vadd.f32 -28.0, %v833_v60 }
 0x274   : > { %1246 = vlog2.f32 %v1059_v50 }
 0x275   : > { %786 = vadd.xlane.f32.xlu1 %v775_v27  ;;  %782 = vadd.xlane.f32.xlu0 %v773_v38  ;;  %1248 = vlog2.f32 %v1067_v52 }
 0x276   : > { %790 = vadd.xlane.f32.xlu2 %v777_v40  ;;  %v1239_v58 = vpop.eup %1238  ;;  %1250 = vlog2.f32 %v1058_v54 }
 0x277   : > { %v1241_v62 = vpop.eup %1240  ;;  %1252 = vlog2.f32 %v1066_v56  ;;  %v817_v1 = vmul.f32 0.6931472, %v1239_v58 }
 0x278   : > { %v1243_v2 = vpop.eup %1242  ;;  %1254 = vlog2.f32 %v1056_v59  ;;  %v849_v8 = vmul.f32 0.6931472, %v1241_v62 }
 0x279   : > { %v1245_v4 = vpop.eup %1244  ;;  %1256 = vlog2.f32 %v1064_v0  ;;  %v813_v12 = vmul.f32 0.6931472, %v1243_v2 }
 0x27a   : > { %v1247_v42 = vpop.eup %1246  ;;  %1258 = vlog2.f32 %v1060_v3  ;;  %v845_v61 = vmul.f32 0.6931472, %v1245_v4  ;;  %v862_v30 = vadd.f32 %v849_v8, %v817_v1 }
 0x27b   : > { %v1249_v7 = vpop.eup %1248  ;;  %1260 = vlog2.f32 %v1068_v5  ;;  %v821_v14 = vmul.f32 0.6931472, %v1247_v42 }
 0x27c   : > { %v1251_v13 = vpop.eup %1250  ;;  %v853_v16 = vmul.f32 0.6931472, %v1249_v7  ;;  %v860_v11 = vadd.f32 %v845_v61, %v813_v12  ;;  %1262 = vlog2.f32 %v1062_v63 }
 0x27d   : > { %794 = vadd.xlane.f32.xlu1 %v779_v17  ;;  %792 = vadd.xlane.f32.xlu0 %v778_v20  ;;  %v1253_v23 = vpop.eup %1252  ;;  %1264 = vlog2.f32 %v1070_v18  ;;  %v819_v49 = vmul.f32 0.6931472, %v1251_v13 }
 0x27e   : > { %v1255_v35 = vpop.eup %1254  ;;  %v864_v10 = vadd.f32 %v853_v16, %v821_v14  ;;  %1266 = vlog2.f32 %v1061_v44  ;;  %v851_v37 = vmul.f32 0.6931472, %v1253_v23 }
 0x27f   : > { %v1257_v22 = vpop.eup %1256  ;;  %1268 = vlog2.f32 %v1069_v19  ;;  %v815_v25 = vmul.f32 0.6931472, %v1255_v35 }
 0x280   : > { %v1259_v15 = vpop.eup %1258  ;;  %v847_v39 = vmul.f32 0.6931472, %v1257_v22  ;;  %v863_v29 = vadd.f32 %v851_v37, %v819_v49 }
 0x281   : > { %v1261_v31 = vpop.eup %1260  ;;  %v823_v20 = vmul.f32 0.6931472, %v1259_v15 }
 0x282   : > { %v855_v41 = vmul.f32 0.6931472, %v1261_v31  ;;  %v1263_v43 = vpop.eup %1262  ;;  %v861_v47 = vadd.f32 %v847_v39, %v815_v25 }
 0x283   : > { %v1265_v45 = vpop.eup %1264  ;;  %v827_v50 = vmul.f32 0.6931472, %v1263_v43 }
 0x284   : > { %v1267_v46 = vpop.eup %1266  ;;  %v865_v34 = vadd.f32 %v855_v41, %v823_v20  ;;  %v859_v52 = vmul.f32 0.6931472, %v1265_v45 }
 0x285   : > { %v1269_v21 = vpop.eup %1268  ;;  %v825_v54 = vmul.f32 0.6931472, %v1267_v46 }
 0x286   : > { %v857_v55 = vmul.f32 0.6931472, %v1269_v21  ;;  %v867_v57 = vadd.f32 %v859_v52, %v827_v50 }
 0x288   : > { %v866_v58 = vadd.f32 %v857_v55, %v825_v54 }
 0x2e0   : > { %v785_v33 = vpop.xlane.xlu1 %784  ;;  %v781_v36 = vpop.xlane.xlu0 %780 }
 0x2e1   : > { %v870_v27 = vsub.f32 %v862_v30, %v785_v33  ;;  %v868_v38 = vsub.f32 %v860_v11, %v781_v36  ;;  %v789_v40 = vpop.xlane.xlu2 %788 }
 0x2e2   : > { %v872_v17 = vsub.f32 %v864_v10, %v789_v40 }
 0x2e3   : > { %878 = vst.msk [vmem:[%s1743_s9 + $0x10] sm:$0xff] %vm495_vm2, %v870_v27 }
 0x2e4   : > { %876 = vst.msk [vmem:[%s1743_s9] sm:$0xff] %vm495_vm2, %v868_v38 }
 0x2e5   : > { %880 = vst.msk [vmem:[%s1743_s9 + $0x20] sm:$0xff] %vm495_vm2, %v872_v17 }
 0x2e8   : > { %v787_v24 = vpop.xlane.xlu1 %786  ;;  %v783_v48 = vpop.xlane.xlu0 %782 }
 0x2e9   : > { %v871_v53 = vsub.f32 %v863_v29, %v787_v24  ;;  %v869_v32 = vsub.f32 %v861_v47, %v783_v48  ;;  %v791_v28 = vpop.xlane.xlu2 %790 }
 0x2ea   : > { %v873_v56 = vsub.f32 %v865_v34, %v791_v28 }
 0x2eb   : > { %879 = vst.msk [vmem:[%s1743_s9 + $0x18] sm:$0xff] %vm495_vm2, %v871_v53 }
 0x2ec   : > { %877 = vst.msk [vmem:[%s1743_s9 + $0x8] sm:$0xff] %vm495_vm2, %v869_v32 }
 0x2ed   : > { %881 = vst.msk [vmem:[%s1743_s9 + $0x28] sm:$0xff] %vm495_vm2, %v873_v56 }
 0x2f0   : > { %v795_v59 = vpop.xlane.xlu1 %794  ;;  %v793_v60 = vpop.xlane.xlu0 %792 }
 0x2f1   : > { %v875_v62 = vsub.f32 %v867_v57, %v795_v59  ;;  %v874_v0 = vsub.f32 %v866_v58, %v793_v60 }
 0x2f3   : > { %883 = vst.msk [vmem:[%s1743_s9 + $0x38] sm:$0xff] %vm495_vm2, %v875_v62 }
 0x2f4   : > { %882 = vst.msk [vmem:[%s1743_s9 + $0x30] sm:$0xff] %vm495_vm2, %v874_v0 }
 0x2f5 PF: > { %s23_s25 = sadd.s32 1, %s1492_s25   ;;  %s2080_s28 = sld [smem:[#allocation19_spill]] }
 0x2f6   : > { %p20_p10 = scmp.ge.s32.totalorder %s23_s25, 6   ;;  %s2081_s22 = sld [smem:[#allocation17_spill]] }
 0x2f7   : > { %s2082_s29 = sld [smem:[#allocation18_spill]]  ;;  %s2084_s15 = smov %s1456_s16 }
 0x2f8   : > { %s2083_s24 = sld [smem:[#allocation20_spill]]  ;;  %s2085_s16 = smov %s1460_s17 }
 0x2f9   : > { %s2087_s18 = smov %s1468_s19  ;;  %s2088_s19 = smov %s1472_s20 }
 0x2fa   : > { %s2089_s20 = smov %s1680_s21  ;;  %s2090_s21 = smov %s1484_s23 }
 0x2fb   : > { %s2086_s17 = smov %s2080_s28  ;;  %22 = sbr.rel (!%p20_p10) target bundleno = 16 (0x10), region = 125 }
 0x2fd   : > { %s2091_s23 = smov %s2082_s29 }
 0x300   :  { %906 = vsyncpa [#allocation5], 1 }
 0x301   :  { %908 = vsyncpa [#allocation5 + $0x1], 1 }
 0x302   :  { %909 = vsyncpa [#allocation7], 1 }
 0x303   :  { %911 = vsyncpa [#allocation7 + $0x1], 1 }
 0x304   :  { %912 = vsyncpa [#allocation10], 1 }
 0x305   :  { %914 = vsyncpa [#allocation10 + $0x1], 1 }

</bundles_post_ra>
